<compile_context>
chip_gen: v6e
topology: v6e:2x2x1
jax: 0.10.0
libtpu: 0.0.40
codegen_flags: <defaults>
</compile_context>

<pallas_src>
import math
import jax
import jax.numpy as jnp
from jax.experimental import pallas as pl
from jax.experimental.pallas import tpu as pltpu


# --------------------------------------------------------------------------
# Kernel 1: support = X @ W   (row-tiled, f32 accumulate, bf16 output)
# --------------------------------------------------------------------------
def _support_kernel(x_ref, w_ref, s_ref):
    s_ref[...] = jnp.dot(
        x_ref[...], w_ref[...], preferred_element_type=jnp.float32
    ).astype(s_ref.dtype)


def _compute_support(x, w, *, tm):
    N, Din = x.shape
    Dout = w.shape[1]
    assert N % tm == 0

    vmem_bytes = (
        2 * tm * Din * x.dtype.itemsize      # X row-tile double buffer
        + 2 * Din * Dout * w.dtype.itemsize  # W (grid-invariant, worst case 2x)
        + 2 * tm * Dout * 2                  # bf16 output double buffer
        + (4 << 20)                          # headroom
    )

    return pl.pallas_call(
        _support_kernel,
        out_shape=jax.ShapeDtypeStruct((N, Dout), jnp.bfloat16),
        grid_spec=pltpu.PrefetchScalarGridSpec(
            num_scalar_prefetch=0,
            grid=(N // tm,),
            in_specs=[
                pl.BlockSpec((tm, Din), lambda i: (i, 0)),    # X row tile
                pl.BlockSpec((Din, Dout), lambda i: (0, 0)),  # full W (invariant)
            ],
            out_specs=pl.BlockSpec((tm, Dout), lambda i: (i, 0)),
        ),
        compiler_params=pltpu.CompilerParams(
            dimension_semantics=("parallel",),
            vmem_limit_bytes=int(vmem_bytes),
        ),
    )(x, w)


# --------------------------------------------------------------------------
# Kernel 2: output = A @ support + bias   (row-parallel, K-tiled reduction)
# --------------------------------------------------------------------------
def _aggregate_kernel(adj_ref, s_ref, b_ref, out_ref, acc_ref):
    k = pl.program_id(1)

    @pl.when(k == 0)
    def _():
        acc_ref[...] = jnp.zeros_like(acc_ref)

    acc_ref[...] += jnp.dot(
        adj_ref[...], s_ref[...], preferred_element_type=jnp.float32
    )

    @pl.when(k == pl.num_programs(1) - 1)
    def _():
        out_ref[...] = (acc_ref[...] + b_ref[...]).astype(out_ref.dtype)


def _aggregate(adj_bf16, support_bf16, bias2d, *, tm, tk):
    N = adj_bf16.shape[0]
    Dout = support_bf16.shape[1]
    assert adj_bf16.shape == (N, N)
    assert N % tm == 0 and N % tk == 0

    vmem_bytes = (
        2 * tm * tk * 2          # adjacency block double buffer (bf16)
        + 2 * tk * Dout * 2      # support block double buffer (bf16)
        + 2 * tm * Dout * 4      # output tile double buffer (f32)
        + tm * Dout * 4          # accumulator scratch (f32)
        + 2 * 8 * max(Dout, 128) * 4  # bias (padded)
        + (4 << 20)              # headroom
    )

    return pl.pallas_call(
        _aggregate_kernel,
        out_shape=jax.ShapeDtypeStruct((N, Dout), jnp.float32),
        grid_spec=pltpu.PrefetchScalarGridSpec(
            num_scalar_prefetch=0,
            grid=(N // tm, N // tk),            # rows parallel, K reduction last
            in_specs=[
                pl.BlockSpec((tm, tk), lambda i, k: (i, k)),     # adjacency block
                pl.BlockSpec((tk, Dout), lambda i, k: (k, 0)),   # support block
                pl.BlockSpec((1, Dout), lambda i, k: (0, 0)),    # bias (invariant)
            ],
            out_specs=pl.BlockSpec((tm, Dout), lambda i, k: (i, 0)),
            scratch_shapes=[pltpu.VMEM((tm, Dout), jnp.float32)],
        ),
        compiler_params=pltpu.CompilerParams(
            dimension_semantics=("parallel", "arbitrary"),
            vmem_limit_bytes=int(vmem_bytes),
        ),
    )(adj_bf16, support_bf16, bias2d)


# --------------------------------------------------------------------------
# Public wrapper: full GCN layer forward
# --------------------------------------------------------------------------
def graph_convolution(adjacency, input_feature, weight, bias, *, tm=256, tk=256):
    """adjacency [N, N], input_feature [N, Din], weight [Din, Dout], bias [Dout]."""
    N, Din = input_feature.shape
    Dout = weight.shape[1]
    assert adjacency.shape == (N, N)

    tm = min(tm, N)
    tk = min(tk, N)
    assert N % tm == 0 and N % tk == 0, "N must be divisible by the row/K tiles"

    # bf16 MXU operands, f32 accumulation (perf review: halves HBM traffic of
    # the dominant N x N adjacency stream and the support operand).
    x_bf16 = input_feature.astype(jnp.bfloat16)
    w_bf16 = weight.astype(jnp.bfloat16)
    adj_bf16 = adjacency.astype(jnp.bfloat16)
    bias2d = bias.reshape(1, Dout).astype(jnp.float32)

    support = _compute_support(x_bf16, w_bf16, tm=tm)          # [N, Dout] bf16 in HBM
    return _aggregate(adj_bf16, support, bias2d, tm=tm, tk=tk)  # [N, Dout] f32


def init_params(key, input_dim, output_dim):
    # Mirror torch.nn.init.kaiming_uniform_(weight) defaults on an
    # (input_dim, output_dim) tensor: fan_in = dim-1 = output_dim, gain=sqrt(2).
    fan_in = output_dim
    bound = math.sqrt(2.0) * math.sqrt(3.0 / fan_in)
    weight = jax.random.uniform(
        key, (input_dim, output_dim), jnp.float32, minval=-bound, maxval=bound
    )
    bias = jnp.zeros((output_dim,), jnp.float32)
    return weight, bias


if __name__ == "__main__":
    key = jax.random.PRNGKey(0)
    k_adj, k_x, k_w = jax.random.split(key, 3)

    # Small but MXU-friendly demo shapes (multiples of 128).
    N, Din, Dout = 512, 128, 128

    adjacency = jax.random.uniform(k_adj, (N, N), jnp.float32)
    input_feature = jax.random.normal(k_x, (N, Din), jnp.float32)
    weight, bias = init_params(k_w, Din, Dout)

    out = graph_convolution(adjacency, input_feature, weight, bias, tm=256, tk=256)
    out = jax.block_until_ready(out)

    # Reference in f32; tolerance relaxed for bf16 MXU operands (f32 accumulate).
    ref = adjacency @ (input_feature @ weight) + bias[None, :]
    assert out.shape == (N, Dout)
    assert jnp.allclose(out, ref, rtol=2e-2, atol=5e-1), (
        float(jnp.max(jnp.abs(out - ref)))
    )

    print("KERNEL_OK")
</pallas_src>

<mosaic_0001>
module attributes {stable_mosaic.version = 11 : i64} {
  func.func @_support_kernel(%arg0: i32, %arg1: memref<256x128xbf16, #tpu.memory_space<vmem>>, %arg2: memref<128x128xbf16, #tpu.memory_space<vmem>>, %arg3: memref<256x128xbf16, #tpu.memory_space<vmem>>) attributes {dimension_semantics = [#tpu.dimension_semantics<parallel>], iteration_bounds = array<i64: 2>, scalar_prefetch = 0 : i64, scratch_operands = 0 : i64, tpu.core_type = #tpu.core_type<tc>, window_params = [{transform_indices = @transform_0, window_bounds = array<i64: 256, 128>}, {pipeline_mode = #tpu.pipeline_mode<synchronous>, transform_indices = @transform_1, window_bounds = array<i64: 128, 128>}, {transform_indices = @transform_2, window_bounds = array<i64: 256, 128>}]} {
    %c0 = arith.constant 0 : index
    %c0_0 = arith.constant 0 : index
    %0 = vector.load %arg1[%c0, %c0_0] : memref<256x128xbf16, #tpu.memory_space<vmem>>, vector<256x128xbf16>
    %c0_1 = arith.constant 0 : index
    %c0_2 = arith.constant 0 : index
    %1 = vector.load %arg2[%c0_1, %c0_2] : memref<128x128xbf16, #tpu.memory_space<vmem>>, vector<128x128xbf16>
    %cst = arith.constant dense<0.000000e+00> : vector<256x128xf32>
    %2 = tpu.matmul %0, %1, %cst {dimension_numbers = #tpu.dot_dimension_numbers<[1], [0], [0], [1], [0, 0, 1, 1], [], []>} : vector<256x128xbf16>, vector<128x128xbf16>, vector<256x128xf32> -> vector<256x128xf32>
    %3 = arith.truncf %2 : vector<256x128xf32> to vector<256x128xbf16>
    %c0_3 = arith.constant 0 : index
    %c0_4 = arith.constant 0 : index
    %4 = vector.load %arg3[%c0_3, %c0_4] : memref<256x128xbf16, #tpu.memory_space<vmem>>, vector<256x128xbf16>
    tpu.vector_store %arg3[%c0_3, %c0_4], %3 {strides = array<i32>} : memref<256x128xbf16, #tpu.memory_space<vmem>>, vector<256x128xbf16>,
    return
  }
  func.func @transform_0(%arg0: i32) -> (i32, i32) {
    %c0_i32 = arith.constant 0 : i32
    %c0_i32_0 = arith.constant 0 : i32
    return %arg0, %c0_i32 : i32, i32
  }
  func.func @transform_1(%arg0: i32) -> (i32, i32) {
    %c0_i32 = arith.constant 0 : i32
    %c0_i32_0 = arith.constant 0 : i32
    %c0_i32_1 = arith.constant 0 : i32
    return %c0_i32, %c0_i32_0 : i32, i32
  }
  func.func @transform_2(%arg0: i32) -> (i32, i32) {
    %c0_i32 = arith.constant 0 : i32
    %c0_i32_0 = arith.constant 0 : i32
    return %arg0, %c0_i32 : i32, i32
  }
}

</mosaic_0001>

<bundles_post_ra>
// kernel: tpu_custom_call.1
= control target key start
LH: loop header
LB: loop body
LE: loop exit
PB: predicated region body
PF: predicated region fallthrough
CT: control target
= control target key end

     0   :  { %7 = vsyncpa [#allocation3], 0  ;;  %s1534_s0 = inlined_call_operand.hbm [shape: bf16[512,128], index: 0, kind: input, shape index: {}]   ;;  %s1535_s1 = inlined_call_operand.hbm [shape: bf16[128,128], index: 1, kind: input, shape index: {}]   ;;  %s1536_s2 = inlined_call_operand.hbm [shape: bf16[512,128], index: 2, kind: output, shape index: {}]  }
   0x1   :  { %9 = vsyncpa [#allocation3 + $0x1], 0 }
   0x2   :  { %10 = vsyncpa [#allocation6], 0 }
   0x3   :  { %11 = vsyncpa [#allocation4], 0 }
   0x4   :  { %13 = vsyncpa [#allocation4 + $0x1], 0  ;;  %s1310_s9 = smov 0   ;;  %s1312_s10 = smov 0  }
   0x5   :  { %s1314_s11 = smov 0   ;;  %s1316_s12 = smov 0  }
   0x6 LB: > { %s1331_s13 = sadd.s32 4294967295, %s1286_s12   ;;  %s790_s14 = sadd.s32 4294967294, %s1286_s12   ;;  %s1286_s12 = sphi %s1316_s12, %s1558_s12   ;;  %s1282_s11 = sphi %s1314_s11, %s1557_s11   ;;  %s1278_s10 = sphi %s1312_s10, %s1556_s10   ;;  %s1274_s9 = sphi %s1310_s9, %s1555_s9  }
   0x7   : > { %p39_p0 = scmp.ne.s32.totalorder %s1278_s10, %s1274_s9  ;;  %p1537_p1 = scmp.eq.s32.totalorder %s1331_s13, 0 }
   0x8   : > { %p90_p3 = scmp.eq.s32.totalorder %s790_s14, 1  ;;  %p791_p5 = scmp.ge.s32.totalorder %s1286_s12, 1 }
   0x9   : > { %p1340_p4 = por %p1537_p1, %p39_p0  ;;  %p97_p7 = scmp.lt.s32.totalorder %s1286_s12, 3 }
   0xa   : > { %p1345_p6 = por %p90_p3, %p39_p0  ;;  %s1288_s18 = smov [#allocation5]  }
   0xb   : > { %s1541_s15 = scalar_select %p1340_p4, 1, 0 }
   0xc   : > { %s1542_s16 = scalar_select %p1345_p6, 1, 0 }
   0xd   : > { %p1350_p8 = pnand %p791_p5, %p97_p7  ;;  %s109_s19 = sshll.u32 %s1288_s18, 4  ;;  %s110_s19 = int_to_ptr.vmem [resolvable:$true] %s109_s19 }
   0xe   : > { %s1364_s21 = sadd.s32 1, %s1286_s12   ;;  %s26_s22 = sadd.s32 1, %s1282_s11 }
   0xf   : > { %s1543_s17 = scalar_select %p1350_p8, 1, 0 }
  0x10   : > { %p1087_p9 = pneg %p1350_p8  ;;  %s23_s23 = ssub.s32 %s1286_s12, %s1364_s21 }
  0x11   : > { %s1175_s24 = scalar_lea.vmem %s110_s19, 1024  ;;  %p1183_p5 = scmp.lt.s32.totalorder %s110_s19, %s110_s19 }
  0x12   : > { %p1359_p11 = pnand %p1087_p9, %p1537_p1  ;;  %p1176_p13 = scmp.ne.s32.totalorder %s110_s19, %s1175_s24 }
  0x13   : > { %p1184_p7 = scmp.lt.s32.totalorder %s1175_s24, %s1175_s24 }
  0x14   : > { %p1166_p12 = pneg %p1359_p11 }
  0x15   : > { %p1185_p10 = por %p1184_p7, %p1183_p5 }
  0x16   : > { %p1178_p0 = pnand %p1176_p13, %p1166_p12 }
  0x18   : > { %p1179_p3 = pneg %p1178_p0 }
  0x1a   : > { %p1186_p2 = pnand %p1185_p10, %p1179_p3 }
  0x1c   : > { %1189 = shalt.err (!%p1186_p2)
}
  0x1d   : > { %s1289_s25 = smov 64   ;;  %s1290_s26 = smov 4  }
  0x1e   : > { %1090 = dma.hbm_to_vmem [thread:$0]  (!%p1359_p11), %s1535_s1, 1024, %s110_s19, [#allocation6], %s1289_s25, %s1289_s25, %s1290_s26  }
  0x1f   : > { %p24_p2 = scmp.eq.s32.totalorder %s23_s23, 0  ;;  %p33_p9 = scmp.ne.s32.totalorder %s1282_s11, %s1278_s10 }
  0x20   : > { %p34_p10 = scmp.eq.s32.totalorder %s1286_s12, 0  ;;  %p1100_p12 = scmp.lt.s32.totalorder %s1286_s12, 2 }
  0x21   : > { %s1384_s29 = scalar_select %p24_p2, %s1282_s11, %s26_s22  }
  0x22   : > { %p35_p13 = por %p34_p10, %p33_p9  ;;  %p1545_p0 = scmp.eq.s32.totalorder %s1331_s13, 1 }
  0x23   : > { %s123_s3 = sand.u32 1, %s1282_s11   ;;  %s862_s4 = sshll.u32 %s1286_s12, 11 }
  0x24   : > { %p1388_p3 = por %p1545_p0, %p33_p9  ;;  %s794_s5 = sshll.u32 %s123_s3, 7 }
  0x25   : > { %s1397_s8 = scalar_lea.hbm %s1534_s0, %s862_s4  ;;  %s127_s14 = scalar_lea.vmem [#allocation2], %s794_s5 }
  0x26   : > { %s1546_s30 = scalar_select %p1388_p3, 1, 0 }
  0x27   : > { %s134_s18 = sshll.u32 %s127_s14, 4  ;;  %p1399_p11 = pnand %p1100_p12, %p35_p13  ;;  %s1403_s18 = int_to_ptr.vmem [resolvable:$true] %s134_s18 }
  0x28   : > { %s1405_s20 = scalar_lea.sflag [#allocation3], %s123_s3  ;;  %s1190_s22 = scalar_lea.hbm %s1397_s8, 2048 }
  0x29   : > { %p1191_p5 = scmp.ne.s32.totalorder %s1397_s8, %s1190_s22  ;;  %p1192_p7 = pneg %p1399_p11 }
  0x2a   : > { %s1195_s27 = scalar_lea.hbm %s1534_s0, 4096  ;;  %p1196_p10 = scmp.lt.s32.totalorder %s1397_s8, %s1534_s0 }
  0x2b   : > { %p1193_p2 = pnand %p1192_p7, %p1191_p5  ;;  %p1197_p12 = scmp.lt.s32.totalorder %s1195_s27, %s1190_s22 }
  0x2d   : > { %p1194_p9 = pneg %p1193_p2  ;;  %p1198_p13 = por %p1197_p12, %p1196_p10 }
  0x2f   : > { %p1199_p0 = pnand %p1198_p13, %p1194_p9 }
  0x31   : > { %1202 = shalt.err (!%p1199_p0)
}
  0x32   : > { %s1203_s3 = scalar_lea.vmem %s1403_s18, 2048  ;;  %s1291_s5 = smov [#allocation2]  }
  0x33   : > { %p1204_p1 = scmp.ne.s32.totalorder %s1403_s18, %s1203_s3  ;;  %s1208_s6 = sshll.u32 %s1291_s5, 4  ;;  %s1209_s6 = int_to_ptr.vmem [resolvable:$false] %s1208_s6 }
  0x34   : > { %s1210_s7 = scalar_lea.vmem %s1209_s6, 4096  ;;  %p1211_p2 = scmp.lt.s32.totalorder %s1403_s18, %s1209_s6 }
  0x35   : > { %p1206_p6 = pnand %p1204_p1, %p1192_p7  ;;  %p1212_p3 = scmp.lt.s32.totalorder %s1210_s7, %s1203_s3 }
  0x37   : > { %p1207_p5 = pneg %p1206_p6  ;;  %p1213_p4 = por %p1212_p3, %p1211_p2 }
  0x39   : > { %p1214_p8 = pnand %p1213_p4, %p1207_p5 }
  0x3b   : > { %1217 = shalt.err (!%p1214_p8)
}
  0x3c   : > { %1094 = dma.hbm_to_vmem [thread:$0]  (!%p1399_p11), %s1397_s8, 2048, %s1403_s18, %s1405_s20, %s1289_s25, %s1289_s25, %s1290_s26  }
  0x3d   : > { %p1548_p1 = scmp.ne.s32.totalorder %s1543_s17, 0 }
  0x3e   : > { %s1432_s14 = sand.u32 (!%p1548_p1), 1, %s1278_s10   ;;  %p1549_p4 = scmp.ne.s32.totalorder (!%p1548_p1), %s1541_s15, 0 }
  0x3f   : > { %146 = sbr.rel (%p1548_p1) target bundleno = 344 (0x158), region = 28  ;;  %s798_s22 = sshll.u32 (!%p1548_p1), %s1432_s14, 7 }
  0x40   : > { %s149_s23 = scalar_lea.sflag (!%p1548_p1), [#allocation3], %s1432_s14  ;;  %s1438_s19 = scalar_lea.vmem (!%p1548_p1), [#allocation2], %s798_s22 }
  0x44   : > { %1261 = dma.done.wait (%p1549_p4), %s149_s23, 2048  }
  0x45   : > { %1263 = vsyncadd (%p1549_p4), %s149_s23, 4294965248  ;;  %p1550_p6 = scmp.eq.s32.totalorder %s1331_s13, 0 }
  0x47   : > { %1265 = dma.done.wait (%p1550_p6), [#allocation6], 1024   ;;  %p1551_p8 = pmov %p1550_p6 }
  0x48   : > { %v1140_v0 = vld [vmem:[#allocation5 + $0x38] sm:$0xff]   ;;  %v1141_v1 = vld [vmem:[#allocation5 + $0x30] sm:$0xff]   ;;  %v1142_v2 = vld [vmem:[#allocation5 + $0x28] sm:$0xff]   ;;  %s1466_s15 = scalar_lea.vmem [#allocation7], %s798_s22  ;;  %s895_s17 = sshll.u32 %s1331_s13, 11 }
  0x49   : > { %1267 = vsyncadd (%p1551_p8), [#allocation6], 4294966272  ;;  %1015 = vmatprep.subr.bf16.mxu0 %v1140_v0  ;;  %1063 = vmatprep.subr.bf16.mxu1 %v1140_v0  ;;  %v1143_v3 = vld [vmem:[#allocation5 + $0x20] sm:$0xff]   ;;  %v1144_v6 = vld [vmem:[#allocation5 + $0x18] sm:$0xff]   ;;  %s707_s25 = sshll.u32 %s1466_s15, 4  ;;  %s1485_s18 = scalar_lea.hbm %s1536_s2, %s895_s17  ;;  %s1487_s25 = int_to_ptr.vmem [resolvable:$true] %s707_s25 }
  0x4a   : > { %1016 = vmatpush3.bf16.msra.mxu0 %v1140_v0  ;;  %1071 = vmatpush3.bf16.msra.mxu1 %v1140_v0  ;;  %v1148_v4 = vld [vmem:[%s1438_s19] sm:$0xff]   ;;  %v1145_v7 = vld [vmem:[#allocation5 + $0x10] sm:$0xff]   ;;  %v1146_v8 = vld [vmem:[#allocation5 + $0x8] sm:$0xff]   ;;  %s694_s13 = scalar_lea.sflag [#allocation4], %s1432_s14  ;;  %s1218_s20 = scalar_lea.vmem %s1487_s25, 2048 }
  0x4b   : > { %1017 = vmatprep.subr.bf16.mxu0 %v1141_v1  ;;  %1064 = vmatprep.subr.bf16.mxu1 %v1141_v1  ;;  %v1149_v5 = vld [vmem:[%s1438_s19 + $0x40] sm:$0xff]   ;;  %v1150_v10 = vld [vmem:[%s1438_s19 + $0x8] sm:$0xff]   ;;  %v1152_v12 = vld [vmem:[%s1438_s19 + $0x10] sm:$0xff]   ;;  %p1219_p3 = scmp.ne.s32.totalorder %s1487_s25, %s1218_s20  ;;  %p1552_p11 = scmp.ne.s32.totalorder %s1546_s30, 0 }
  0x4c   : > { %1031 = vmatprep.mubr.bf16.mxu0 %v1148_v4  ;;  %1047 = vmatprep.mubr.bf16.mxu1 %v1149_v5  ;;  %v1147_v9 = vld [vmem:[#allocation5] sm:$0xff]   ;;  %v1151_v11 = vld [vmem:[%s1438_s19 + $0x48] sm:$0xff]   ;;  %v1153_v13 = vld [vmem:[%s1438_s19 + $0x50] sm:$0xff]   ;;  %s1292_s24 = smov [#allocation7]  }
  0x4d   : > { %v1154_v14 = vld [vmem:[%s1438_s19 + $0x18] sm:$0xff]   ;;  %v1156_v16 = vld [vmem:[%s1438_s19 + $0x20] sm:$0xff]   ;;  %v1158_v18 = vld [vmem:[%s1438_s19 + $0x28] sm:$0xff]   ;;  %p1220_p7 = pnand %p1219_p3, %p1552_p11  ;;  %s1222_s27 = sshll.u32 %s1292_s24, 4  ;;  %s1223_s27 = int_to_ptr.vmem [resolvable:$false] %s1222_s27 }
  0x4e   : > { %1018 = vmatpush3.bf16.msra.mxu0 %v1141_v1  ;;  %1072 = vmatpush3.bf16.msra.mxu1 %v1141_v1  ;;  %v1155_v15 = vld [vmem:[%s1438_s19 + $0x58] sm:$0xff]   ;;  %v1157_v17 = vld [vmem:[%s1438_s19 + $0x60] sm:$0xff]   ;;  %v1159_v19 = vld [vmem:[%s1438_s19 + $0x68] sm:$0xff]   ;;  %s1224_s28 = scalar_lea.vmem %s1223_s27, 4096  ;;  %p1225_p10 = scmp.lt.s32.totalorder %s1487_s25, %s1223_s27 }
  0x4f   : > { %1019 = vmatprep.subr.bf16.mxu0 %v1142_v2  ;;  %1065 = vmatprep.subr.bf16.mxu1 %v1142_v2  ;;  %v1160_v20 = vld [vmem:[%s1438_s19 + $0x30] sm:$0xff]   ;;  %v1162_v22 = vld [vmem:[%s1438_s19 + $0x38] sm:$0xff]   ;;  %p1221_p9 = pneg %p1220_p7  ;;  %p1226_p12 = scmp.lt.s32.totalorder %s1224_s28, %s1218_s20 }
  0x50   : > { %v1161_v21 = vld [vmem:[%s1438_s19 + $0x70] sm:$0xff]   ;;  %v1163_v23 = vld [vmem:[%s1438_s19 + $0x78] sm:$0xff]  }
  0x51   : > { %p1227_p13 = por %p1226_p12, %p1225_p10 }
  0x52   : > { %1020 = vmatpush3.bf16.msra.mxu0 %v1142_v2  ;;  %1073 = vmatpush3.bf16.msra.mxu1 %v1142_v2 }
  0x53   : > { %1021 = vmatprep.subr.bf16.mxu0 %v1143_v3  ;;  %1066 = vmatprep.subr.bf16.mxu1 %v1143_v3  ;;  %p1228_p0 = pnand %p1227_p13, %p1221_p9 }
  0x56   : > { %1022 = vmatpush3.bf16.msra.mxu0 %v1143_v3  ;;  %1074 = vmatpush3.bf16.msra.mxu1 %v1143_v3 }
  0x57   : > { %1023 = vmatprep.subr.bf16.mxu0 %v1144_v6  ;;  %1067 = vmatprep.subr.bf16.mxu1 %v1144_v6 }
  0x5a   : > { %1024 = vmatpush3.bf16.msra.mxu0 %v1144_v6  ;;  %1075 = vmatpush3.bf16.msra.mxu1 %v1144_v6 }
  0x5b   : > { %1025 = vmatprep.subr.bf16.mxu0 %v1145_v7  ;;  %1068 = vmatprep.subr.bf16.mxu1 %v1145_v7 }
  0x5e   : > { %1026 = vmatpush3.bf16.msra.mxu0 %v1145_v7  ;;  %1076 = vmatpush3.bf16.msra.mxu1 %v1145_v7 }
  0x5f   : > { %1027 = vmatprep.subr.bf16.mxu0 %v1146_v8  ;;  %1069 = vmatprep.subr.bf16.mxu1 %v1146_v8 }
  0x62   : > { %1028 = vmatpush3.bf16.msra.mxu0 %v1146_v8  ;;  %1077 = vmatpush3.bf16.msra.mxu1 %v1146_v8 }
  0x63   : > { %1029 = vmatprep.subr.bf16.mxu0 %v1147_v9  ;;  %1070 = vmatprep.subr.bf16.mxu1 %v1147_v9 }
  0x66   : > { %1030 = vmatpush3.bf16.msra.mxu0 %v1147_v9  ;;  %1078 = vmatpush3.bf16.msra.mxu1 %v1147_v9 }
  0x69   : > { %1032 = vmatmul.mubr.bf16.vlgmr.msra.gmra.mxu0 %v1150_v10  ;;  %1048 = vmatmul.mubr.bf16.vlgmr.msra.gmra.mxu1 %v1151_v11 }
  0x6a   : > { %1035 = vmatprep.mubr.bf16.mxu0 %v1152_v12  ;;  %1051 = vmatprep.mubr.bf16.mxu1 %v1153_v13 }
  0x71   : > { %1036 = vmatmul.mubr.bf16.gmra.mxu0 %v1154_v14  ;;  %1052 = vmatmul.mubr.bf16.gmra.mxu1 %v1155_v15 }
  0x72   : > { %1039 = vmatprep.mubr.bf16.mxu0 %v1156_v16  ;;  %1055 = vmatprep.mubr.bf16.mxu1 %v1157_v17 }
  0x79   : > { %1040 = vmatmul.mubr.bf16.gmra.mxu0 %v1158_v18  ;;  %1056 = vmatmul.mubr.bf16.gmra.mxu1 %v1159_v19 }
  0x7a   : > { %1043 = vmatprep.mubr.bf16.mxu0 %v1160_v20  ;;  %1059 = vmatprep.mubr.bf16.mxu1 %v1161_v21 }
  0x81   : > { %1044 = vmatmul.mubr.bf16.gmra.mxu0 %v1162_v22  ;;  %1060 = vmatmul.mubr.bf16.gmra.mxu1 %v1163_v23 }
 0x129   : > { %v1033_v24 = vpop.f32.mrf.mxu0  ;;  %v1049_v25 = vpop.f32.mrf.mxu1 }
 0x12b   : > { %v406_v26 = vpop.f32.mrf.mxu0  ;;  %v470_v27 = vpop.f32.mrf.mxu1 }
 0x12d   : > { %v1034_v28 = vpop.f32.mrf.mxu0  ;;  %v1050_v29 = vpop.f32.mrf.mxu1 }
 0x12e   : > { %v904_v30 = vpack.c.bf16 %v1034_v28, %v1033_v24  ;;  %v944_v31 = vpack.c.bf16 %v1050_v29, %v1049_v25 }
 0x12f   : > { %v409_v32 = vpop.f32.mrf.mxu0  ;;  %v473_v33 = vpop.f32.mrf.mxu1 }
 0x130   : > { %976 = vst [vmem:[%s1466_s15 + $0x8] sm:$0xff] %v904_v30   ;;  %984 = vst [vmem:[%s1466_s15 + $0x48] sm:$0xff] %v944_v31   ;;  %v899_v34 = vpack.c.bf16 %v409_v32, %v406_v26  ;;  %v939_v35 = vpack.c.bf16 %v473_v33, %v470_v27 }
 0x131   : > { %v1037_v36 = vpop.f32.mrf.mxu0  ;;  %v1053_v37 = vpop.f32.mrf.mxu1 }
 0x132   : > { %900 = vst [vmem:[%s1466_s15] sm:$0xff] %v899_v34   ;;  %983 = vst [vmem:[%s1466_s15 + $0x40] sm:$0xff] %v939_v35  }
 0x133   : > { %v422_v38 = vpop.f32.mrf.mxu0  ;;  %v486_v39 = vpop.f32.mrf.mxu1 }
 0x135   : > { %v1038_v40 = vpop.f32.mrf.mxu0  ;;  %v1054_v41 = vpop.f32.mrf.mxu1 }
 0x136   : > { %v914_v42 = vpack.c.bf16 %v1038_v40, %v1037_v36  ;;  %v954_v43 = vpack.c.bf16 %v1054_v41, %v1053_v37 }
 0x137   : > { %v425_v44 = vpop.f32.mrf.mxu0  ;;  %v489_v45 = vpop.f32.mrf.mxu1 }
 0x138   : > { %978 = vst [vmem:[%s1466_s15 + $0x18] sm:$0xff] %v914_v42   ;;  %986 = vst [vmem:[%s1466_s15 + $0x58] sm:$0xff] %v954_v43   ;;  %v909_v46 = vpack.c.bf16 %v425_v44, %v422_v38  ;;  %v949_v47 = vpack.c.bf16 %v489_v45, %v486_v39 }
 0x139   : > { %v1041_v48 = vpop.f32.mrf.mxu0  ;;  %v1057_v49 = vpop.f32.mrf.mxu1 }
 0x13a   : > { %977 = vst [vmem:[%s1466_s15 + $0x10] sm:$0xff] %v909_v46   ;;  %985 = vst [vmem:[%s1466_s15 + $0x50] sm:$0xff] %v949_v47  }
 0x13b   : > { %v438_v50 = vpop.f32.mrf.mxu0  ;;  %v502_v51 = vpop.f32.mrf.mxu1 }
 0x13d   : > { %v1042_v52 = vpop.f32.mrf.mxu0  ;;  %v1058_v53 = vpop.f32.mrf.mxu1 }
 0x13e   : > { %v924_v54 = vpack.c.bf16 %v1042_v52, %v1041_v48  ;;  %v964_v55 = vpack.c.bf16 %v1058_v53, %v1057_v49 }
 0x13f   : > { %v441_v56 = vpop.f32.mrf.mxu0  ;;  %v505_v57 = vpop.f32.mrf.mxu1 }
 0x140   : > { %980 = vst [vmem:[%s1466_s15 + $0x28] sm:$0xff] %v924_v54   ;;  %988 = vst [vmem:[%s1466_s15 + $0x68] sm:$0xff] %v964_v55   ;;  %v919_v58 = vpack.c.bf16 %v441_v56, %v438_v50  ;;  %v959_v59 = vpack.c.bf16 %v505_v57, %v502_v51 }
 0x141   : > { %v1045_v60 = vpop.f32.mrf.mxu0  ;;  %v1061_v61 = vpop.f32.mrf.mxu1 }
 0x142   : > { %979 = vst [vmem:[%s1466_s15 + $0x20] sm:$0xff] %v919_v58   ;;  %987 = vst [vmem:[%s1466_s15 + $0x60] sm:$0xff] %v959_v59  }
 0x143   : > { %v454_v62 = vpop.f32.mrf.mxu0  ;;  %v518_v63 = vpop.f32.mrf.mxu1 }
 0x145   : > { %v1046_v0 = vpop.f32.mrf.mxu0  ;;  %v1062_v1 = vpop.f32.mrf.mxu1 }
 0x146   : > { %v934_v2 = vpack.c.bf16 %v1046_v0, %v1045_v60  ;;  %v974_v3 = vpack.c.bf16 %v1062_v1, %v1061_v61 }
 0x147   : > { %v457_v4 = vpop.f32.mrf.mxu0  ;;  %v521_v5 = vpop.f32.mrf.mxu1 }
 0x148   : > { %982 = vst [vmem:[%s1466_s15 + $0x38] sm:$0xff] %v934_v2   ;;  %990 = vst [vmem:[%s1466_s15 + $0x78] sm:$0xff] %v974_v3   ;;  %v929_v6 = vpack.c.bf16 %v457_v4, %v454_v62  ;;  %v969_v7 = vpack.c.bf16 %v521_v5, %v518_v63 }
 0x14a   : > { %981 = vst [vmem:[%s1466_s15 + $0x30] sm:$0xff] %v929_v6   ;;  %989 = vst [vmem:[%s1466_s15 + $0x70] sm:$0xff] %v969_v7  }
 0x14b   : > { %1231 = shalt.err (!%p1228_p0)
}
 0x14c   : > { %s1232_s4 = scalar_lea.hbm %s1485_s18, 2048  ;;  %s1236_s6 = scalar_lea.hbm %s1536_s2, 4096 }
 0x14d   : > { %p1233_p5 = scmp.ne.s32.totalorder %s1485_s18, %s1232_s4  ;;  %p1237_p4 = scmp.lt.s32.totalorder %s1485_s18, %s1536_s2 }
 0x14e   : > { %p1238_p6 = scmp.lt.s32.totalorder %s1236_s6, %s1232_s4 }
 0x14f   : > { %p1234_p2 = pnand %p1233_p5, %p1552_p11 }
 0x150   : > { %p1239_p8 = por %p1238_p6, %p1237_p4 }
 0x151   : > { %p1235_p1 = pneg %p1234_p2 }
 0x153   : > { %p1240_p3 = pnand %p1239_p8, %p1235_p1 }
 0x155   : > { %1243 = shalt.err (!%p1240_p3)
}
 0x156   : > { %s1293_s23 = smov 64   ;;  %s1294_s19 = smov 4  }
 0x157   : > { %1085 = dma.vmem_to_hbm [thread:$0]  (%p1552_p11), %s1487_s25, 2048, %s1485_s18, %s694_s13, %s1293_s23, %s1293_s23, %s1294_s19  }
 0x158 PF: > { %s722_s15 = sand.u32 1, %s1274_s9   ;;  %p1553_p7 = scmp.ne.s32.totalorder %s1542_s16, 0 }
 0x159   : > { %p1554_p9 = scmp.ge.s32.totalorder %s1286_s12, 2  ;;  %s723_s17 = scalar_lea.sflag [#allocation4], %s722_s15 }
 0x15b   : > { %p1096_p10 = pnand %p1554_p9, %p1553_p7 }
 0x15d   : > { %p1097_p12 = pneg %p1096_p10 }
 0x15f   : > { %1269 = dma.done.wait (%p1097_p12), %s723_s17, 2048  }
 0x160   : > { %1271 = vsyncadd (%p1097_p12), %s723_s17, 4294965248  ;;  %p16_p13 = scmp.ge.s32.totalorder %s1364_s21, 4   ;;  %s1555_s9 = smov %s1278_s10 }
 0x161   : > { %s1556_s10 = smov %s1282_s11  ;;  %s1557_s11 = smov %s1384_s29 }
 0x162   : > { %s1558_s12 = smov %s1364_s21  ;;  %18 = sbr.rel (!%p16_p13) target bundleno = 6 (0x6), region = 77 }
 0x167   :  { %728 = vsyncpa [#allocation3], 1 }
 0x168   :  { %730 = vsyncpa [#allocation3 + $0x1], 1 }
 0x169   :  { %731 = vsyncpa [#allocation6], 1 }
 0x16a   :  { %732 = vsyncpa [#allocation4], 1 }
 0x16b   :  { %734 = vsyncpa [#allocation4 + $0x1], 1 }

</bundles_post_ra>
